<compile_context>
chip_gen: v5e
topology: v5e:2x2
jax: 0.10.0
libtpu: 0.0.40
codegen_flags: <defaults>
</compile_context>

<pallas_src>
import jax
import jax.numpy as jnp
from jax.experimental import pallas as pl
from jax.experimental.pallas import tpu as pltpu

LANES = 128       # lane-dense output slab: action axis padded to 128 lanes
NEG_INF = -1e30   # f32 bias on padded action columns -> softmax gives them ~0


def _actor_kernel(x_ref, w1_ref, b1_ref, w2_ref, b2_ref, w3_ref, b3_ref,
                  probs_ref):
    # In-kernel bf16 cast of the f32 state (avoids a wrapper cast pass over
    # the input in HBM; the VPU cast hides under MXU/DMA slack).
    x = x_ref[...].astype(jnp.bfloat16)                          # (TB, S)

    # Linear(state_dim -> hidden) + ReLU  (bf16 MXU operands, f32 accumulate)
    h1 = jnp.dot(x, w1_ref[...], preferred_element_type=jnp.float32)
    h1 = jnp.maximum(h1 + b1_ref[...], 0.0)                      # (TB, H) f32

    # Linear(hidden -> 32) + ReLU
    h2 = jnp.dot(h1.astype(jnp.bfloat16), w2_ref[...],
                 preferred_element_type=jnp.float32)
    h2 = jnp.maximum(h2 + b2_ref[...], 0.0)                      # (TB, 32) f32

    # Linear(32 -> action_dim); action axis pre-padded to 128 lanes.  Padded
    # columns carry a -1e30 f32 bias (b3 stays f32!) so softmax zeroes them.
    logits = jnp.dot(h2.astype(jnp.bfloat16), w3_ref[...],
                     preferred_element_type=jnp.float32)
    logits = logits + b3_ref[...]                                # (TB, 128) f32

    # Row softmax (dim=1) with exact normalization: one divide per row, then a
    # broadcast multiply.  Rows sum to 1 up to bf16 output rounding.
    m = jnp.max(logits, axis=1, keepdims=True)
    e = jnp.exp(logits - m)
    inv = 1.0 / jnp.sum(e, axis=1, keepdims=True)
    probs_ref[...] = (e * inv).astype(probs_ref.dtype)           # bf16 store


def _round_up(x, m):
    return ((x + m - 1) // m) * m


def _make_spec(shape, index_map, n_buffers=None):
    """BlockSpec, optionally requesting deeper pipelining (graceful fallback)."""
    if n_buffers is not None and hasattr(pl, "Buffered"):
        try:
            return pl.BlockSpec(shape, index_map,
                                pipeline_mode=pl.Buffered(n_buffers))
        except TypeError:
            pass
    return pl.BlockSpec(shape, index_map)


def pack_params(params):
    """One-time parameter packing (hoisted out of the per-call hot path):
    bf16 weight casts + 128-lane padding of the last layer."""
    w1, b1, w2, b2, w3, b3 = params
    A = w3.shape[1]
    assert A <= LANES, "action_dim must fit in one 128-lane slab"

    w3p = jnp.zeros((w3.shape[0], LANES), jnp.float32).at[:, :A].set(w3)
    b3p = jnp.full((1, LANES), NEG_INF, jnp.float32).at[:, :A].set(
        b3.reshape(1, -1))
    # The -1e30 padding trick requires b3p to stay f32 (do NOT quantize it).
    assert b3p.dtype == jnp.float32

    return {
        "w1": w1.astype(jnp.bfloat16),
        "b1": b1.reshape(1, -1).astype(jnp.float32),
        "w2": w2.astype(jnp.bfloat16),
        "b2": b2.reshape(1, -1).astype(jnp.float32),
        "w3": w3p.astype(jnp.bfloat16),
        "b3": b3p,                      # f32, padded with -1e30
        "action_dim": A,
    }


def actor_forward(state, packed, *, block_b=2048):
    """Fused Actor MLP + softmax.

    Returns a (B_pad, 128) bf16 probability slab (batch padded to the tile,
    action axis padded to 128 lanes).  Consumers slice [:B, :action_dim]; that
    slice fuses into the downstream op instead of costing an extra HBM pass.
    """
    w1, b1 = packed["w1"], packed["b1"]
    w2, b2 = packed["w2"], packed["b2"]
    w3, b3 = packed["w3"], packed["b3"]
    B, S = state.shape
    H = w1.shape[1]

    # Tile size: multiple of 16 (bf16 sublane packing), <= block_b (2048 is
    # ~86% of HBM roofline on v6e, a few MiB of VMEM), and sized so large
    # batches give >=4 grid steps (keeps both v7x TensorCores busy).
    TB = min(block_b, max(16, _round_up(-(-B // 4), 16)))
    B_pad = _round_up(B, TB)
    num_steps = B_pad // TB
    grid = (num_steps,)

    x = state.astype(jnp.float32)
    if B_pad != B:
        x = jnp.pad(x, ((0, B_pad - B), (0, 0)))    # pad once, on the f32 input

    # Advisory cost hint: memory-bound, output-write dominated, tiny flops.
    flops = 2 * B_pad * (S * H + H * 32 + 32 * LANES)
    bytes_accessed = (B_pad * S * 4                      # f32 state read
                      + B_pad * LANES * 2                # bf16 probs write
                      + (w1.size + w2.size + w3.size) * 2
                      + (b1.size + b2.size + b3.size) * 4)
    cost = pl.CostEstimate(flops=flops, transcendentals=B_pad * LANES,
                           bytes_accessed=bytes_accessed)

    resident = lambda arr: pl.BlockSpec(arr.shape, lambda i: (0,) * arr.ndim)

    def _run(n_buffers):
        in_specs = [
            _make_spec((TB, S), lambda i: (i, 0), n_buffers),  # streamed state
            resident(w1), resident(b1),                        # VMEM-resident
            resident(w2), resident(b2),
            resident(w3), resident(b3),
        ]
        out_spec = _make_spec((TB, LANES), lambda i: (i, 0), n_buffers)
        return pl.pallas_call(
            _actor_kernel,
            out_shape=jax.ShapeDtypeStruct((B_pad, LANES), jnp.bfloat16),
            grid=grid,
            in_specs=in_specs,
            out_specs=out_spec,
            compiler_params=pltpu.CompilerParams(
                dimension_semantics=("parallel",)),
            cost_estimate=cost,
        )(x, w1, b1, w2, b2, w3, b3)

    # Deeper pipelining only pays off with a multi-step grid; fall back to the
    # default double-buffered pipeline if this JAX build rejects Buffered.
    if num_steps > 2:
        try:
            return _run(3)
        except Exception:
            return _run(None)
    return _run(None)


def init_params(key, state_dim, hidden_dim, action_dim):
    """Deterministic synthetic parameters (shapes match the torch module)."""
    ks = jax.random.split(key, 6)

    def lin(kw, kb, fan_in, fan_out):
        bound = 1.0 / jnp.sqrt(fan_in)
        w = jax.random.uniform(kw, (fan_in, fan_out), jnp.float32, -bound, bound)
        b = jax.random.uniform(kb, (1, fan_out), jnp.float32, -bound, bound)
        return w, b

    w1, b1 = lin(ks[0], ks[1], state_dim, hidden_dim)
    w2, b2 = lin(ks[2], ks[3], hidden_dim, 32)
    w3, b3 = lin(ks[4], ks[5], 32, action_dim)
    return (w1, b1, w2, b2, w3, b3)


def actor_reference(state, params):
    """Pure-JAX reference mirroring the kernel's bf16-operand / f32-accumulate
    matmuls (so tolerances stay tight)."""
    w1, b1, w2, b2, w3, b3 = params
    bf = jnp.bfloat16
    h1 = jax.nn.relu(
        jnp.dot(state.astype(bf), w1.astype(bf),
                preferred_element_type=jnp.float32) + b1)
    h2 = jax.nn.relu(
        jnp.dot(h1.astype(bf), w2.astype(bf),
                preferred_element_type=jnp.float32) + b2)
    logits = jnp.dot(h2.astype(bf), w3.astype(bf),
                     preferred_element_type=jnp.float32) + b3
    return jax.nn.softmax(logits, axis=1)


def _check(batch, state_dim, hidden_dim, action_dim, seed):
    key = jax.random.PRNGKey(seed)
    k_state, k_params = jax.random.split(key)
    state = jax.random.normal(k_state, (batch, state_dim), jnp.float32)
    raw = init_params(k_params, state_dim, hidden_dim, action_dim)
    packed = pack_params(raw)                      # one-time, out of hot path

    probs_padded = actor_forward(state, packed)
    probs_padded = jax.block_until_ready(probs_padded)

    # Consumer-side slice (would fuse into sampling / log-prob under jit).
    probs = probs_padded[:batch, :action_dim].astype(jnp.float32)

    ref = actor_reference(state, raw)
    assert probs.shape == (batch, action_dim)
    # bf16 output rounding -> slightly relaxed tolerances
    assert jnp.allclose(jnp.sum(probs, axis=1), 1.0, atol=1e-2)
    assert jnp.allclose(probs, ref, atol=2e-2, rtol=2e-2)


if __name__ == "__main__":
    # Small single-tile case (grid of 1 step).
    _check(batch=4, state_dim=16, hidden_dim=64, action_dim=8, seed=0)
    # Multi-step grid case (exercises batch tiling + ragged-tail padding).
    _check(batch=40, state_dim=16, hidden_dim=64, action_dim=8, seed=0)
    print("KERNEL_OK")
</pallas_src>

<mosaic_0001>
module attributes {stable_mosaic.version = 11 : i64} {
  func.func @_actor_kernel(%arg0: i32, %arg1: memref<16x16xf32, #tpu.memory_space<vmem>>, %arg2: memref<16x64xbf16, #tpu.memory_space<vmem>>, %arg3: memref<1x64xf32, #tpu.memory_space<vmem>>, %arg4: memref<64x32xbf16, #tpu.memory_space<vmem>>, %arg5: memref<1x32xf32, #tpu.memory_space<vmem>>, %arg6: memref<32x128xbf16, #tpu.memory_space<vmem>>, %arg7: memref<1x128xf32, #tpu.memory_space<vmem>>, %arg8: memref<16x128xbf16, #tpu.memory_space<vmem>>) attributes {dimension_semantics = [#tpu.dimension_semantics<parallel>], iteration_bounds = array<i64: 1>, scalar_prefetch = 0 : i64, scratch_operands = 0 : i64, tpu.core_type = #tpu.core_type<tc>, window_params = [{transform_indices = @transform_0, window_bounds = array<i64: 16, 16>}, {pipeline_mode = #tpu.pipeline_mode<synchronous>, transform_indices = @transform_1, window_bounds = array<i64: 16, 64>}, {pipeline_mode = #tpu.pipeline_mode<synchronous>, transform_indices = @transform_2, window_bounds = array<i64: 1, 64>}, {pipeline_mode = #tpu.pipeline_mode<synchronous>, transform_indices = @transform_3, window_bounds = array<i64: 64, 32>}, {pipeline_mode = #tpu.pipeline_mode<synchronous>, transform_indices = @transform_4, window_bounds = array<i64: 1, 32>}, {pipeline_mode = #tpu.pipeline_mode<synchronous>, transform_indices = @transform_5, window_bounds = array<i64: 32, 128>}, {pipeline_mode = #tpu.pipeline_mode<synchronous>, transform_indices = @transform_6, window_bounds = array<i64: 1, 128>}, {transform_indices = @transform_7, window_bounds = array<i64: 16, 128>}]} {
    %c0 = arith.constant 0 : index
    %c0_0 = arith.constant 0 : index
    %0 = vector.load %arg1[%c0, %c0_0] : memref<16x16xf32, #tpu.memory_space<vmem>>, vector<16x16xf32>
    %1 = arith.truncf %0 : vector<16x16xf32> to vector<16x16xbf16>
    %c0_1 = arith.constant 0 : index
    %c0_2 = arith.constant 0 : index
    %2 = vector.load %arg2[%c0_1, %c0_2] : memref<16x64xbf16, #tpu.memory_space<vmem>>, vector<16x64xbf16>
    %cst = arith.constant dense<0.000000e+00> : vector<16x64xf32>
    %3 = tpu.matmul %1, %2, %cst {dimension_numbers = #tpu.dot_dimension_numbers<[1], [0], [0], [1], [0, 0, 1, 1], [], []>} : vector<16x16xbf16>, vector<16x64xbf16>, vector<16x64xf32> -> vector<16x64xf32>
    %c0_3 = arith.constant 0 : index
    %c0_4 = arith.constant 0 : index
    %4 = vector.load %arg3[%c0_3, %c0_4] : memref<1x64xf32, #tpu.memory_space<vmem>>, vector<1x64xf32>
    %5 = vector.broadcast %4 : vector<1x64xf32> to vector<16x64xf32>
    %6 = arith.addf %3, %5 : vector<16x64xf32>
    %cst_5 = arith.constant 0.000000e+00 : f32
    %7 = vector.broadcast %cst_5 : f32 to vector<16x64xf32>
    %8 = arith.maximumf %6, %7 : vector<16x64xf32>
    %9 = arith.truncf %8 : vector<16x64xf32> to vector<16x64xbf16>
    %c0_6 = arith.constant 0 : index
    %c0_7 = arith.constant 0 : index
    %10 = vector.load %arg4[%c0_6, %c0_7] : memref<64x32xbf16, #tpu.memory_space<vmem>>, vector<64x32xbf16>
    %cst_8 = arith.constant dense<0.000000e+00> : vector<16x32xf32>
    %11 = tpu.matmul %9, %10, %cst_8 {dimension_numbers = #tpu.dot_dimension_numbers<[1], [0], [0], [1], [0, 0, 1, 1], [], []>} : vector<16x64xbf16>, vector<64x32xbf16>, vector<16x32xf32> -> vector<16x32xf32>
    %c0_9 = arith.constant 0 : index
    %c0_10 = arith.constant 0 : index
    %12 = vector.load %arg5[%c0_9, %c0_10] : memref<1x32xf32, #tpu.memory_space<vmem>>, vector<1x32xf32>
    %13 = vector.broadcast %12 : vector<1x32xf32> to vector<16x32xf32>
    %14 = arith.addf %11, %13 : vector<16x32xf32>
    %cst_11 = arith.constant 0.000000e+00 : f32
    %15 = vector.broadcast %cst_11 : f32 to vector<16x32xf32>
    %16 = arith.maximumf %14, %15 : vector<16x32xf32>
    %17 = arith.truncf %16 : vector<16x32xf32> to vector<16x32xbf16>
    %c0_12 = arith.constant 0 : index
    %c0_13 = arith.constant 0 : index
    %18 = vector.load %arg6[%c0_12, %c0_13] : memref<32x128xbf16, #tpu.memory_space<vmem>>, vector<32x128xbf16>
    %cst_14 = arith.constant dense<0.000000e+00> : vector<16x128xf32>
    %19 = tpu.matmul %17, %18, %cst_14 {dimension_numbers = #tpu.dot_dimension_numbers<[1], [0], [0], [1], [0, 0, 1, 1], [], []>} : vector<16x32xbf16>, vector<32x128xbf16>, vector<16x128xf32> -> vector<16x128xf32>
    %c0_15 = arith.constant 0 : index
    %c0_16 = arith.constant 0 : index
    %20 = vector.load %arg7[%c0_15, %c0_16] : memref<1x128xf32, #tpu.memory_space<vmem>>, vector<1x128xf32>
    %21 = vector.broadcast %20 : vector<1x128xf32> to vector<16x128xf32>
    %22 = arith.addf %19, %21 : vector<16x128xf32>
    %cst_17 = arith.constant dense<0xFF800000> : vector<16xf32>
    %23 = vector.multi_reduction <maximumf>, %22, %cst_17 [1] : vector<16x128xf32> to vector<16xf32>
    %24 = vector.shape_cast %23 : vector<16xf32> to vector<16x1xf32>
    %25 = vector.broadcast %24 : vector<16x1xf32> to vector<16x128xf32>
    %26 = arith.subf %22, %25 : vector<16x128xf32>
    %27 = math.exp %26 : vector<16x128xf32>
    %cst_18 = arith.constant dense<0.000000e+00> : vector<16xf32>
    %28 = vector.multi_reduction <add>, %27, %cst_18 [1] : vector<16x128xf32> to vector<16xf32>
    %29 = vector.shape_cast %28 : vector<16xf32> to vector<16x1xf32>
    %cst_19 = arith.constant 1.000000e+00 : f32
    %30 = vector.broadcast %cst_19 : f32 to vector<16x1xf32>
    %31 = arith.divf %30, %29 : vector<16x1xf32>
    %32 = vector.broadcast %31 : vector<16x1xf32> to vector<16x128xf32>
    %33 = arith.mulf %27, %32 : vector<16x128xf32>
    %34 = arith.truncf %33 : vector<16x128xf32> to vector<16x128xbf16>
    %c0_20 = arith.constant 0 : index
    %c0_21 = arith.constant 0 : index
    %35 = vector.load %arg8[%c0_20, %c0_21] : memref<16x128xbf16, #tpu.memory_space<vmem>>, vector<16x128xbf16>
    tpu.vector_store %arg8[%c0_20, %c0_21], %34 {strides = array<i32>} : memref<16x128xbf16, #tpu.memory_space<vmem>>, vector<16x128xbf16>,
    return
  }
  func.func @transform_0(%arg0: i32) -> (i32, i32) {
    %c0_i32 = arith.constant 0 : i32
    %c0_i32_0 = arith.constant 0 : i32
    return %arg0, %c0_i32 : i32, i32
  }
  func.func @transform_1(%arg0: i32) -> (i32, i32) {
    %c0_i32 = arith.constant 0 : i32
    %c0_i32_0 = arith.constant 0 : i32
    %c0_i32_1 = arith.constant 0 : i32
    return %c0_i32, %c0_i32_0 : i32, i32
  }
  func.func @transform_2(%arg0: i32) -> (i32, i32) {
    %c0_i32 = arith.constant 0 : i32
    %c0_i32_0 = arith.constant 0 : i32
    %c0_i32_1 = arith.constant 0 : i32
    return %c0_i32, %c0_i32_0 : i32, i32
  }
  func.func @transform_3(%arg0: i32) -> (i32, i32) {
    %c0_i32 = arith.constant 0 : i32
    %c0_i32_0 = arith.constant 0 : i32
    %c0_i32_1 = arith.constant 0 : i32
    return %c0_i32, %c0_i32_0 : i32, i32
  }
  func.func @transform_4(%arg0: i32) -> (i32, i32) {
    %c0_i32 = arith.constant 0 : i32
    %c0_i32_0 = arith.constant 0 : i32
    %c0_i32_1 = arith.constant 0 : i32
    return %c0_i32, %c0_i32_0 : i32, i32
  }
  func.func @transform_5(%arg0: i32) -> (i32, i32) {
    %c0_i32 = arith.constant 0 : i32
    %c0_i32_0 = arith.constant 0 : i32
    %c0_i32_1 = arith.constant 0 : i32
    return %c0_i32, %c0_i32_0 : i32, i32
  }
  func.func @transform_6(%arg0: i32) -> (i32, i32) {
    %c0_i32 = arith.constant 0 : i32
    %c0_i32_0 = arith.constant 0 : i32
    %c0_i32_1 = arith.constant 0 : i32
    return %c0_i32, %c0_i32_0 : i32, i32
  }
  func.func @transform_7(%arg0: i32) -> (i32, i32) {
    %c0_i32 = arith.constant 0 : i32
    %c0_i32_0 = arith.constant 0 : i32
    return %arg0, %c0_i32 : i32, i32
  }
}

</mosaic_0001>

<bundles_post_ra>
// kernel: tpu_custom_call.1
= control target key start
LH: loop header
LB: loop body
LE: loop exit
PB: predicated region body
PF: predicated region fallthrough
CT: control target
= control target key end

     0   :  { %vm43_vm0 = vcmask 130048   ;;  %s392_s0 = inlined_call_operand.vmem [shape: f32[16,16], index: 0, kind: input, shape index: {}]   ;;  %s393_s1 = inlined_call_operand.vmem [shape: bf16[16,64], index: 1, kind: input, shape index: {}]   ;;  %s394_s2 = inlined_call_operand.vmem [shape: f32[1,64], index: 2, kind: input, shape index: {}]   ;;  %s395_s3 = inlined_call_operand.vmem [shape: bf16[64,32], index: 3, kind: input, shape index: {}]   ;;  %s396_s4 = inlined_call_operand.vmem [shape: f32[1,32], index: 4, kind: input, shape index: {}]   ;;  %s397_s5 = inlined_call_operand.vmem [shape: bf16[32,128], index: 5, kind: input, shape index: {}]   ;;  %s398_s6 = inlined_call_operand.vmem [shape: f32[1,128], index: 6, kind: input, shape index: {}]   ;;  %s399_s7 = inlined_call_operand.hbm [shape: bf16[16,128], index: 7, kind: output, shape index: {}]  }
   0x1   :  { %v258_v0 = vld [vmem:[%s393_s1] sm:$0xff]  ;;  %v29_v2 = vld [vmem:[%s392_s0 + $0x8] sm:$0xff] }
   0x2   :  { %v28_v1 = vld [vmem:[%s392_s0] sm:$0xff]  ;;  %54 = vmatpush.bf16.msra.mxu0 %v258_v0 }
   0x3   :  { %v30_v3 = vpack.c.bf16 %v29_v2, %v28_v1 }
   0x4   :  { %12 = vsyncpa [#allocation3], 0  ;;  %v262_v4 = vld [vmem:[%s395_s3 + $0x18] sm:$0xff]  ;;  %v261_v5 = vld [vmem:[%s395_s3 + $0x10] sm:$0xff]  ;;  %vm100_vm1 = vcmask 523264   ;;  %vm141_vm2 = vcmask 261120  }
   0x5   :  { %231 = vmatmul.msk.bf16.vlgmr.msra.gmra.mxu0 %vm43_vm0, %v30_v3  ;;  %108 = vmatpush.bf16.msra.mxu1 %v262_v4  ;;  %v260_v6 = vld [vmem:[%s395_s3 + $0x8] sm:$0xff]  ;;  %v259_v7 = vld [vmem:[%s395_s3] sm:$0xff]  ;;  %s215_s22 = sshll.u32 %s399_s7, 4  ;;  %s311_s23 = smov 64   ;;  %s216_s22 = int_to_ptr.hbm [resolvable:$true] %s215_s22 }
   0x6   :  { %v273_v9 = vld [vmem:[%s394_s2] ss:$0 sm:$0xff]  ;;  %v264_v16 = vld [vmem:[%s397_s5 + $0x8] sm:$0xff]  ;;  %s312_s24 = smov 4  }
   0x7   :  { %151 = vmatpush.bf16.msra.mxu2 %v264_v16  ;;  %v263_v17 = vld [vmem:[%s397_s5] sm:$0xff] }
   0x8   :  { %v274_v19 = vld [vmem:[%s396_s4] ss:$0 sm:$0xff]  ;;  %s310_s4 = smov [#allocation2]  }
   0x9   :  { %109 = vmatpush.bf16.msra.mxu1 %v261_v5  ;;  %v275_v26 = vld [vmem:[%s398_s6] ss:$0 sm:$0xff]  ;;  %s213_s5 = sshll.u32 %s310_s4, 4  ;;  %s214_s5 = int_to_ptr.vmem [resolvable:$true] %s213_s5 }
   0xb   :  { %152 = vmatpush.bf16.msra.mxu2 %v263_v17 }
   0xd   :  { %110 = vmatpush.bf16.msra.mxu1 %v260_v6 }
  0x11   :  { %111 = vmatpush.bf16.msra.mxu1 %v259_v7 }
  0x82   :  { %v56_v8 = vpop.f32.mrf.mxu0 }
  0x83   :  { %v57_v10 = vadd.f32 %v273_v9, %v56_v8 }
  0x85   :  { %v61_v13 = vmax.f32 %v57_v10, 0.0 }
  0x8a   :  { %v58_v11 = vpop.f32.mrf.mxu0 }
  0x8b   :  { %v59_v12 = vadd.f32 %v273_v9, %v58_v11 }
  0x8d   :  { %v62_v14 = vmax.f32 %v59_v12, 0.0 }
  0x8f   :  { %v63_v15 = vpack.c.bf16 %v62_v14, %v61_v13 }
  0x91   :  { %248 = vmatmul.msk.bf16.vlgmr.msra.gmra.mxu1 %vm100_vm1, %v63_v15 }
 0x10e   :  { %v113_v18 = vpop.f32.mrf.mxu1 }
 0x10f   :  { %v114_v20 = vadd.f32 %v274_v19, %v113_v18 }
 0x111   :  { %v118_v23 = vmax.f32 %v114_v20, 0.0 }
 0x116   :  { %v115_v21 = vpop.f32.mrf.mxu1 }
 0x117   :  { %v116_v22 = vadd.f32 %v274_v19, %v115_v21 }
 0x119   :  { %v119_v24 = vmax.f32 %v116_v22, 0.0 }
 0x11b   :  { %v120_v25 = vpack.c.bf16 %v119_v24, %v118_v23 }
 0x11d   :  { %257 = vmatmul.msk.bf16.vlgmr.msra.gmra.mxu2 %vm141_vm2, %v120_v25 }
 0x1a0   :  { %v154_v27 = vpop.f32.mrf.mxu2 }
 0x1a1   :  { %v155_v28 = vadd.f32 %v275_v26, %v154_v27 }
 0x1a3   :  { %159 = vmax.xlane.f32.xlu0 %v155_v28 }
 0x1a8   :  { %v156_v29 = vpop.f32.mrf.mxu2 }
 0x1a9   :  { %v157_v30 = vadd.f32 %v275_v26, %v156_v29 }
 0x1ab   :  { %161 = vmax.xlane.f32.xlu0 %v157_v30 }
 0x216   :  { %v160_v31 = vpop.xlane.xlu0 %159 }
 0x217   :  { %v163_v32 = vsub.f32 %v155_v28, %v160_v31 }
 0x219   :  { %v165_v33 = vmul.f32 1.442695, %v163_v32 }
 0x21b   :  { %276 = vpow2.f32 %v165_v33 }
 0x21e   :  { %v162_v34 = vpop.xlane.xlu0 %161 }
 0x21f   :  { %v164_v35 = vsub.f32 %v157_v30, %v162_v34 }
 0x221   :  { %v277_v36 = vpop.eup %276  ;;  %v167_v37 = vmul.f32 1.442695, %v164_v35 }
 0x222   :  { %169 = vadd.xlane.f32.xlu1 %v277_v36 }
 0x223   :  { %278 = vpow2.f32 %v167_v37 }
 0x229   :  { %v279_v38 = vpop.eup %278 }
 0x22a   :  { %171 = vadd.xlane.f32.xlu1 %v279_v38 }
 0x295   :  { %v170_v39 = vpop.xlane.xlu1 %169 }
 0x296   :  { %280 = vrcp.f32 %v170_v39  ;;  %v184_v48 = vand.u32 2147483648, %v170_v39  ;;  %vm178_vm4 = vweird.f32 %v170_v39  ;;  %v182_v49 = vand.u32 2147483647, %v170_v39 }
 0x298   :  { %v185_v55 = vor.u32 1.1754944e-38, %v184_v48  ;;  %vm183_vm7 = vcmp.eq.f32.partialorder %v182_v49, 8.507059e+37 }
 0x29c   :  { %v281_v40 = vpop.eup %280 }
 0x29d   :  { %v174_v41 = vmul.f32 %v281_v40, %v170_v39  ;;  %v172_v42 = vpop.xlane.xlu1 %171  ;;  %vm179_vm3 = vweird.f32 %v281_v40 }
 0x29e   :  { %282 = vrcp.f32 %v172_v42  ;;  %vm180_vm5 = vmor %vm178_vm4, %vm179_vm3  ;;  %v199_v51 = vand.u32 2147483648, %v172_v42  ;;  %v197_v54 = vand.u32 2147483647, %v172_v42  ;;  %vm193_vm8 = vweird.f32 %v172_v42 }
 0x29f   :  { %v175_v43 = vsub.f32 1.0, %v174_v41 }
 0x2a0   :  { %v200_v58 = vor.u32 1.1754944e-38, %v199_v51  ;;  %vm198_vm10 = vcmp.eq.f32.partialorder %v197_v54, 8.507059e+37 }
 0x2a1   :  { %v176_v44 = vmul.f32 %v281_v40, %v175_v43 }
 0x2a3   :  { %v177_v46 = vadd.f32 %v281_v40, %v176_v44 }
 0x2a4   :  { %v283_v45 = vpop.eup %282 }
 0x2a5   :  { %v189_v47 = vmul.f32 %v283_v45, %v172_v42  ;;  %v181_v52 = vsel %vm180_vm5, %v281_v40, %v177_v46  ;;  %vm194_vm6 = vweird.f32 %v283_v45 }
 0x2a6   :  { %v186_v57 = vsel %vm183_vm7, %v185_v55, %v181_v52  ;;  %vm195_vm9 = vmor %vm193_vm8, %vm194_vm6 }
 0x2a7   :  { %v190_v50 = vsub.f32 1.0, %v189_v47  ;;  %v203_v62 = vmul.f32 %v277_v36, %v186_v57 }
 0x2a9   :  { %v191_v53 = vmul.f32 %v283_v45, %v190_v50 }
 0x2ab   :  { %v192_v56 = vadd.f32 %v283_v45, %v191_v53 }
 0x2ad   :  { %v196_v59 = vsel %vm195_vm9, %v283_v45, %v192_v56 }
 0x2ae   :  { %v201_v60 = vsel %vm198_vm10, %v200_v58, %v196_v59 }
 0x2af   :  { %v204_v61 = vmul.f32 %v279_v38, %v201_v60 }
 0x2b1   :  { %v268_v63 = vpack.c.bf16 %v204_v61, %v203_v62 }
 0x2b3   :  { %269 = vst [vmem:[#allocation2] sm:$0xff] %v268_v63  }
 0x2b4   :  { %221 = dma.vmem_to_hbm [thread:$0]  %s214_s5, 128, %s216_s22, [#allocation3], %s311_s23, %s311_s23, %s312_s24  }
 0x2b5   :  { %308 = dma.done.wait [#allocation3], 128  }
 0x2b6   :  { %309 = vsyncadd [#allocation3], 4294967168 }
 0x2b7   :  { %226 = vsyncpa [#allocation3], 1 }

</bundles_post_ra>
